<compile_context>
chip_gen: v7x
topology: tpu7x:2x2x1
jax: 0.10.0
libtpu: 0.0.40
codegen_flags: <defaults>
</compile_context>

<pallas_src>
import functools

import jax
import jax.numpy as jnp
from jax.experimental import pallas as pl
from jax.experimental.pallas import tpu as pltpu

KAPPA = 5.25  # gain from DEPLayer.__init__ args


def _round_up(n, m):
    return ((n + m - 1) // m) * m


def _first_layer_dep_kernel(
    x_ref,
    mw_ref, mb_ref,
    w1x_ref, w1d_ref, b1_ref,
    w2_ref, b2_ref,
    w3_ref, b3_ref,
    w4_ref, b4_ref,
    w5_ref, b5_ref,
    y_ref, dep_ref,
):
    # Activations stay f32 for bias adds / tanh (v5e VPU/EUP have no bf16);
    # only the small (batch, K) dot operands are cast to bf16 so every matmul
    # uses the MXU's native bf16 path with f32 accumulation.  Weight tiles are
    # never upcast in-kernel.
    x = x_ref[...]                              # (batch, in) f32
    xb = x.astype(jnp.bfloat16)

    # --- DEP step: dep = tanh(KAPPA*(x @ Mw + Mb)).  KAPPA is pre-folded into
    # mw/mb.  mw AND mb are zero-padded along the output axis, so the padded
    # lanes are tanh(0) == 0 (load-bearing for the split-K layer-1 below) and
    # the store is an unmasked lane-dense vst.
    dep = jnp.tanh(
        jnp.dot(xb, mw_ref[...], preferred_element_type=jnp.float32)
        + mb_ref[...]
    )
    dep_ref[...] = dep                          # (batch, out_pad) f32

    # --- layer 1: split-K sum instead of a lane-axis concat([x, dep]).
    h = jnp.tanh(
        jnp.dot(xb, w1x_ref[...], preferred_element_type=jnp.float32)
        + jnp.dot(dep.astype(jnp.bfloat16), w1d_ref[...],
                  preferred_element_type=jnp.float32)
        + b1_ref[...]
    )

    # --- layers 2..5 (w5/b5 are lane-padded to out_pad).
    for w_ref, b_ref in ((w2_ref, b2_ref), (w3_ref, b3_ref),
                         (w4_ref, b4_ref), (w5_ref, b5_ref)):
        h = jnp.tanh(
            jnp.dot(h.astype(jnp.bfloat16), w_ref[...],
                    preferred_element_type=jnp.float32)
            + b_ref[...]
        )
    y_ref[...] = h                              # (batch, out_pad) f32


def prepare_params(params, input_size, output_size, weight_dtype=jnp.bfloat16):
    """Pre-split/pad/scale/cast the f32 master params into kernel-ready arrays.

    Runs once, outside the hot loop: weights ship as bf16, biases stay f32;
    KAPPA is folded into the DEP head; w1 is split into its x-half and
    dep-half; the DEP head (mw/mb) and the final layer (w5/b5) are zero-padded
    on the output axis to a multiple of 128 lanes so kernel outputs are
    lane-dense.  NOTE: the zero padding of BOTH mw and mb is required for
    correctness of the split-K layer 1 (padded dep lanes must be exactly 0).
    """
    f32 = jnp.float32
    out_pad = _round_up(output_size, 128)

    def pad_cols(a):
        return jnp.zeros((a.shape[0], out_pad), f32).at[:, :a.shape[1]].set(a)

    def pad_rows(a):
        return jnp.zeros((out_pad, a.shape[1]), f32).at[:a.shape[0], :].set(a)

    return {
        "mw": (KAPPA * pad_cols(params["mw"])).astype(weight_dtype),
        "mb": (KAPPA * pad_cols(params["mb"])).astype(f32),
        "w1x": params["w1"][:input_size].astype(weight_dtype),
        "w1d": pad_rows(params["w1"][input_size:]).astype(weight_dtype),
        "b1": params["b1"].astype(f32),
        "w2": params["w2"].astype(weight_dtype), "b2": params["b2"].astype(f32),
        "w3": params["w3"].astype(weight_dtype), "b3": params["b3"].astype(f32),
        "w4": params["w4"].astype(weight_dtype), "b4": params["b4"].astype(f32),
        "w5": pad_cols(params["w5"]).astype(weight_dtype),
        "b5": pad_cols(params["b5"]).astype(f32),
    }


_WEIGHT_ORDER = ("mw", "mb", "w1x", "w1d", "b1", "w2", "b2",
                 "w3", "b3", "w4", "b4", "w5", "b5")


def _cost_estimate(kp, batch, in_size, steps=1):
    """Advisory CostEstimate so XLA schedules this tiny latency-bound call."""
    flops = 0
    param_bytes = 0
    for k in _WEIGHT_ORDER:
        v = kp[k]
        if k == "mw" or k.startswith("w"):
            flops += 2 * batch * v.shape[0] * v.shape[1]
        param_bytes += v.size * v.dtype.itemsize
    out_pad = kp["mw"].shape[1]
    trans = batch * (out_pad + kp["b1"].shape[1] + kp["b2"].shape[1]
                     + kp["b3"].shape[1] + kp["b4"].shape[1] + out_pad)
    io_bytes = batch * (in_size + 2 * out_pad) * 4
    return pl.CostEstimate(
        flops=steps * flops,
        transcendentals=steps * trans,
        bytes_accessed=param_bytes + steps * io_bytes,
    )


def first_layer_dep_forward(x, params, output_size):
    """Single-step fused FirstLayerDEP forward.  Returns (y, dep_output)."""
    batch, in_size = x.shape
    out_pad = params["mw"].shape[1]
    inputs = (x,) + tuple(params[k] for k in _WEIGHT_ORDER)

    vmem = pl.BlockSpec(memory_space=pltpu.MemorySpace.VMEM)
    y_pad, dep_pad = pl.pallas_call(
        _first_layer_dep_kernel,
        out_shape=(
            jax.ShapeDtypeStruct((batch, out_pad), jnp.float32),  # y (padded)
            jax.ShapeDtypeStruct((batch, out_pad), jnp.float32),  # dep (padded)
        ),
        in_specs=[vmem] * len(inputs),
        out_specs=(vmem, vmem),
        cost_estimate=_cost_estimate(params, batch, in_size),
    )(*inputs)
    return y_pad[:, :output_size], dep_pad[:, :output_size]


def first_layer_dep_rollout(xs, params, output_size):
    """T-step rollout in one pallas_call.

    xs: (T, batch, in).  grid=(T,); weights use constant index_maps so they
    are DMA'd to VMEM once and stay resident across all steps; the T axis is
    "parallel" so it shards across both TensorCores on v7x.
    Returns (y, dep) each shaped (T, batch, out).
    """
    T, batch, in_size = xs.shape
    out_pad = params["mw"].shape[1]
    weights = tuple(params[k] for k in _WEIGHT_ORDER)

    def const_spec(a):
        nd = a.ndim
        return pl.BlockSpec(a.shape, lambda t, _nd=nd: (0,) * _nd)

    in_specs = [pl.BlockSpec((None, batch, in_size), lambda t: (t, 0, 0))]
    in_specs += [const_spec(w) for w in weights]
    out_spec = pl.BlockSpec((None, batch, out_pad), lambda t: (t, 0, 0))

    y_pad, dep_pad = pl.pallas_call(
        _first_layer_dep_kernel,
        grid=(T,),
        out_shape=(
            jax.ShapeDtypeStruct((T, batch, out_pad), jnp.float32),
            jax.ShapeDtypeStruct((T, batch, out_pad), jnp.float32),
        ),
        in_specs=in_specs,
        out_specs=(out_spec, out_spec),
        compiler_params=pltpu.CompilerParams(
            dimension_semantics=("parallel",)),
        cost_estimate=_cost_estimate(params, batch, in_size, steps=T),
    )(xs, *weights)
    return y_pad[:, :, :output_size], dep_pad[:, :, :output_size]


def init_params(key, input_size, output_size):
    """PyTorch-style init U(-1/sqrt(fan_in), 1/sqrt(fan_in)).

    Weights are stored transposed, shape (in, out); biases as (1, out).
    """
    sizes = [
        ("m", input_size, output_size),                # DEP inverse model M
        ("1", input_size + output_size, 512),
        ("2", 512, 256),
        ("3", 256, 128),
        ("4", 128, 64),
        ("5", 64, output_size),
    ]
    params = {}
    keys = jax.random.split(key, 2 * len(sizes))
    for i, (name, fan_in, fan_out) in enumerate(sizes):
        bound = 1.0 / jnp.sqrt(jnp.float32(fan_in))
        wk, bk = keys[2 * i], keys[2 * i + 1]
        wname = "mw" if name == "m" else "w" + name
        bname = "mb" if name == "m" else "b" + name
        params[wname] = jax.random.uniform(
            wk, (fan_in, fan_out), jnp.float32, -bound, bound)
        params[bname] = jax.random.uniform(
            bk, (1, fan_out), jnp.float32, -bound, bound)
    return params


def reference_forward(x, params):
    """Pure-JAX f32 reference of the same forward pass."""
    dep = jnp.tanh(KAPPA * (x @ params["mw"] + params["mb"]))
    h = jnp.concatenate([x, dep], axis=1)
    for i in range(1, 6):
        h = jnp.tanh(h @ params[f"w{i}"] + params[f"b{i}"])
    return h, dep


if __name__ == "__main__":
    INPUT_SIZE = 16   # observation dim
    OUTPUT_SIZE = 8   # action dim
    BATCH = 4
    T = 8             # rollout length for the gridded variant

    key = jax.random.PRNGKey(0)
    pkey, xkey, rkey = jax.random.split(key, 3)
    params = init_params(pkey, INPUT_SIZE, OUTPUT_SIZE)
    x = jax.random.normal(xkey, (BATCH, INPUT_SIZE), jnp.float32)
    xs = jax.random.normal(rkey, (T, BATCH, INPUT_SIZE), jnp.float32)

    kparams = prepare_params(params, INPUT_SIZE, OUTPUT_SIZE)

    fwd = jax.jit(functools.partial(
        first_layer_dep_forward, params=kparams, output_size=OUTPUT_SIZE))
    y, dep = fwd(x)
    jax.block_until_ready((y, dep))

    roll = jax.jit(functools.partial(
        first_layer_dep_rollout, params=kparams, output_size=OUTPUT_SIZE))
    ys, deps = roll(xs)
    jax.block_until_ready((ys, deps))

    y_ref, dep_ref = reference_forward(x, params)
    ys_ref, deps_ref = jax.vmap(lambda a: reference_forward(a, params))(xs)

    assert y.shape == (BATCH, OUTPUT_SIZE)
    assert dep.shape == (BATCH, OUTPUT_SIZE)
    assert ys.shape == (T, BATCH, OUTPUT_SIZE)
    assert deps.shape == (T, BATCH, OUTPUT_SIZE)
    assert bool(jnp.all(jnp.isfinite(y))) and bool(jnp.all(jnp.isfinite(dep)))
    # bf16 dot operands vs f32 reference: generous tolerance (tanh saturates).
    assert bool(jnp.allclose(dep, dep_ref, atol=5e-2)), "dep mismatch"
    assert bool(jnp.allclose(y, y_ref, atol=5e-2)), "y mismatch"
    assert bool(jnp.allclose(deps, deps_ref, atol=5e-2)), "rollout dep mismatch"
    assert bool(jnp.allclose(ys, ys_ref, atol=5e-2)), "rollout y mismatch"
    print("KERNEL_OK")
</pallas_src>

<mosaic_0001>
module attributes {stable_mosaic.version = 11 : i64} {
  func.func @_first_layer_dep_kernel(%arg0: memref<4x16xf32, #tpu.memory_space<vmem>>, %arg1: memref<16x128xbf16, #tpu.memory_space<vmem>>, %arg2: memref<1x128xf32, #tpu.memory_space<vmem>>, %arg3: memref<16x512xbf16, #tpu.memory_space<vmem>>, %arg4: memref<128x512xbf16, #tpu.memory_space<vmem>>, %arg5: memref<1x512xf32, #tpu.memory_space<vmem>>, %arg6: memref<512x256xbf16, #tpu.memory_space<vmem>>, %arg7: memref<1x256xf32, #tpu.memory_space<vmem>>, %arg8: memref<256x128xbf16, #tpu.memory_space<vmem>>, %arg9: memref<1x128xf32, #tpu.memory_space<vmem>>, %arg10: memref<128x64xbf16, #tpu.memory_space<vmem>>, %arg11: memref<1x64xf32, #tpu.memory_space<vmem>>, %arg12: memref<64x128xbf16, #tpu.memory_space<vmem>>, %arg13: memref<1x128xf32, #tpu.memory_space<vmem>>, %arg14: memref<4x128xf32, #tpu.memory_space<vmem>>, %arg15: memref<4x128xf32, #tpu.memory_space<vmem>>) attributes {dimension_semantics = [], scalar_prefetch = 0 : i64, scratch_operands = 0 : i64, tpu.core_type = #tpu.core_type<tc>} {
    %c0 = arith.constant 0 : index
    %c0_0 = arith.constant 0 : index
    %0 = vector.load %arg0[%c0, %c0_0] : memref<4x16xf32, #tpu.memory_space<vmem>>, vector<4x16xf32>
    %1 = arith.truncf %0 : vector<4x16xf32> to vector<4x16xbf16>
    %c0_1 = arith.constant 0 : index
    %c0_2 = arith.constant 0 : index
    %2 = vector.load %arg1[%c0_1, %c0_2] : memref<16x128xbf16, #tpu.memory_space<vmem>>, vector<16x128xbf16>
    %cst = arith.constant dense<0.000000e+00> : vector<4x128xf32>
    %3 = tpu.matmul %1, %2, %cst {dimension_numbers = #tpu.dot_dimension_numbers<[1], [0], [0], [1], [0, 0, 1, 1], [], []>} : vector<4x16xbf16>, vector<16x128xbf16>, vector<4x128xf32> -> vector<4x128xf32>
    %c0_3 = arith.constant 0 : index
    %c0_4 = arith.constant 0 : index
    %4 = vector.load %arg2[%c0_3, %c0_4] : memref<1x128xf32, #tpu.memory_space<vmem>>, vector<1x128xf32>
    %5 = vector.broadcast %4 : vector<1x128xf32> to vector<4x128xf32>
    %6 = arith.addf %3, %5 : vector<4x128xf32>
    %7 = math.tanh %6 : vector<4x128xf32>
    %c0_5 = arith.constant 0 : index
    %c0_6 = arith.constant 0 : index
    %8 = vector.load %arg15[%c0_5, %c0_6] : memref<4x128xf32, #tpu.memory_space<vmem>>, vector<4x128xf32>
    tpu.vector_store %arg15[%c0_5, %c0_6], %7 {strides = array<i32>} : memref<4x128xf32, #tpu.memory_space<vmem>>, vector<4x128xf32>,
    %c0_7 = arith.constant 0 : index
    %c0_8 = arith.constant 0 : index
    %9 = vector.load %arg3[%c0_7, %c0_8] : memref<16x512xbf16, #tpu.memory_space<vmem>>, vector<16x512xbf16>
    %cst_9 = arith.constant dense<0.000000e+00> : vector<4x512xf32>
    %10 = tpu.matmul %1, %9, %cst_9 {dimension_numbers = #tpu.dot_dimension_numbers<[1], [0], [0], [1], [0, 0, 1, 1], [], []>} : vector<4x16xbf16>, vector<16x512xbf16>, vector<4x512xf32> -> vector<4x512xf32>
    %11 = arith.truncf %7 : vector<4x128xf32> to vector<4x128xbf16>
    %c0_10 = arith.constant 0 : index
    %c0_11 = arith.constant 0 : index
    %12 = vector.load %arg4[%c0_10, %c0_11] : memref<128x512xbf16, #tpu.memory_space<vmem>>, vector<128x512xbf16>
    %cst_12 = arith.constant dense<0.000000e+00> : vector<4x512xf32>
    %13 = tpu.matmul %11, %12, %cst_12 {dimension_numbers = #tpu.dot_dimension_numbers<[1], [0], [0], [1], [0, 0, 1, 1], [], []>} : vector<4x128xbf16>, vector<128x512xbf16>, vector<4x512xf32> -> vector<4x512xf32>
    %14 = arith.addf %10, %13 : vector<4x512xf32>
    %c0_13 = arith.constant 0 : index
    %c0_14 = arith.constant 0 : index
    %15 = vector.load %arg5[%c0_13, %c0_14] : memref<1x512xf32, #tpu.memory_space<vmem>>, vector<1x512xf32>
    %16 = vector.broadcast %15 : vector<1x512xf32> to vector<4x512xf32>
    %17 = arith.addf %14, %16 : vector<4x512xf32>
    %18 = math.tanh %17 : vector<4x512xf32>
    %19 = arith.truncf %18 : vector<4x512xf32> to vector<4x512xbf16>
    %c0_15 = arith.constant 0 : index
    %c0_16 = arith.constant 0 : index
    %20 = vector.load %arg6[%c0_15, %c0_16] : memref<512x256xbf16, #tpu.memory_space<vmem>>, vector<512x256xbf16>
    %cst_17 = arith.constant dense<0.000000e+00> : vector<4x256xf32>
    %21 = tpu.matmul %19, %20, %cst_17 {dimension_numbers = #tpu.dot_dimension_numbers<[1], [0], [0], [1], [0, 0, 1, 1], [], []>} : vector<4x512xbf16>, vector<512x256xbf16>, vector<4x256xf32> -> vector<4x256xf32>
    %c0_18 = arith.constant 0 : index
    %c0_19 = arith.constant 0 : index
    %22 = vector.load %arg7[%c0_18, %c0_19] : memref<1x256xf32, #tpu.memory_space<vmem>>, vector<1x256xf32>
    %23 = vector.broadcast %22 : vector<1x256xf32> to vector<4x256xf32>
    %24 = arith.addf %21, %23 : vector<4x256xf32>
    %25 = math.tanh %24 : vector<4x256xf32>
    %26 = arith.truncf %25 : vector<4x256xf32> to vector<4x256xbf16>
    %c0_20 = arith.constant 0 : index
    %c0_21 = arith.constant 0 : index
    %27 = vector.load %arg8[%c0_20, %c0_21] : memref<256x128xbf16, #tpu.memory_space<vmem>>, vector<256x128xbf16>
    %cst_22 = arith.constant dense<0.000000e+00> : vector<4x128xf32>
    %28 = tpu.matmul %26, %27, %cst_22 {dimension_numbers = #tpu.dot_dimension_numbers<[1], [0], [0], [1], [0, 0, 1, 1], [], []>} : vector<4x256xbf16>, vector<256x128xbf16>, vector<4x128xf32> -> vector<4x128xf32>
    %c0_23 = arith.constant 0 : index
    %c0_24 = arith.constant 0 : index
    %29 = vector.load %arg9[%c0_23, %c0_24] : memref<1x128xf32, #tpu.memory_space<vmem>>, vector<1x128xf32>
    %30 = vector.broadcast %29 : vector<1x128xf32> to vector<4x128xf32>
    %31 = arith.addf %28, %30 : vector<4x128xf32>
    %32 = math.tanh %31 : vector<4x128xf32>
    %33 = arith.truncf %32 : vector<4x128xf32> to vector<4x128xbf16>
    %c0_25 = arith.constant 0 : index
    %c0_26 = arith.constant 0 : index
    %34 = vector.load %arg10[%c0_25, %c0_26] : memref<128x64xbf16, #tpu.memory_space<vmem>>, vector<128x64xbf16>
    %cst_27 = arith.constant dense<0.000000e+00> : vector<4x64xf32>
    %35 = tpu.matmul %33, %34, %cst_27 {dimension_numbers = #tpu.dot_dimension_numbers<[1], [0], [0], [1], [0, 0, 1, 1], [], []>} : vector<4x128xbf16>, vector<128x64xbf16>, vector<4x64xf32> -> vector<4x64xf32>
    %c0_28 = arith.constant 0 : index
    %c0_29 = arith.constant 0 : index
    %36 = vector.load %arg11[%c0_28, %c0_29] : memref<1x64xf32, #tpu.memory_space<vmem>>, vector<1x64xf32>
    %37 = vector.broadcast %36 : vector<1x64xf32> to vector<4x64xf32>
    %38 = arith.addf %35, %37 : vector<4x64xf32>
    %39 = math.tanh %38 : vector<4x64xf32>
    %40 = arith.truncf %39 : vector<4x64xf32> to vector<4x64xbf16>
    %c0_30 = arith.constant 0 : index
    %c0_31 = arith.constant 0 : index
    %41 = vector.load %arg12[%c0_30, %c0_31] : memref<64x128xbf16, #tpu.memory_space<vmem>>, vector<64x128xbf16>
    %cst_32 = arith.constant dense<0.000000e+00> : vector<4x128xf32>
    %42 = tpu.matmul %40, %41, %cst_32 {dimension_numbers = #tpu.dot_dimension_numbers<[1], [0], [0], [1], [0, 0, 1, 1], [], []>} : vector<4x64xbf16>, vector<64x128xbf16>, vector<4x128xf32> -> vector<4x128xf32>
    %c0_33 = arith.constant 0 : index
    %c0_34 = arith.constant 0 : index
    %43 = vector.load %arg13[%c0_33, %c0_34] : memref<1x128xf32, #tpu.memory_space<vmem>>, vector<1x128xf32>
    %44 = vector.broadcast %43 : vector<1x128xf32> to vector<4x128xf32>
    %45 = arith.addf %42, %44 : vector<4x128xf32>
    %46 = math.tanh %45 : vector<4x128xf32>
    %c0_35 = arith.constant 0 : index
    %c0_36 = arith.constant 0 : index
    %47 = vector.load %arg14[%c0_35, %c0_36] : memref<4x128xf32, #tpu.memory_space<vmem>>, vector<4x128xf32>
    tpu.vector_store %arg14[%c0_35, %c0_36], %46 {strides = array<i32>} : memref<4x128xf32, #tpu.memory_space<vmem>>, vector<4x128xf32>,
    return
  }
}

</mosaic_0001>

<bundles_post_ra>
// kernel: first_layer_dep_forward.1
= control target key start
LH: loop header
LB: loop body
LE: loop exit
PB: predicated region body
PF: predicated region fallthrough
CT: control target
= control target key end

     0   :  { %21 = vsyncpa [#allocation3], 0  ;;  %v1886_v1 = vmov 0.0   ;;  %vm1887_vm0 = vmmov 0   ;;  %vm69_vm1 = vcmask 130048   ;;  %s2446_s0 = inlined_call_operand.vmem [shape: f32[4,16], index: 0, kind: input, shape index: {}]   ;;  %s2447_s1 = inlined_call_operand.vmem [shape: bf16[16,128], index: 1, kind: input, shape index: {}]   ;;  %s2448_s2 = inlined_call_operand.vmem [shape: f32[1,128], index: 2, kind: input, shape index: {}]   ;;  %s2449_s3 = inlined_call_operand.vmem [shape: bf16[16,512], index: 3, kind: input, shape index: {}]   ;;  %s2450_s4 = inlined_call_operand.vmem [shape: bf16[128,512], index: 4, kind: input, shape index: {}]   ;;  %s2451_s5 = inlined_call_operand.vmem [shape: f32[1,512], index: 5, kind: input, shape index: {}]   ;;  %s2452_s6 = inlined_call_operand.vmem [shape: bf16[512,256], index: 6, kind: input, shape index: {}]   ;;  %s2453_s7 = inlined_call_operand.vmem [shape: f32[1,256], index: 7, kind: input, shape index: {}]   ;;  %s2454_s8 = inlined_call_operand.vmem [shape: bf16[256,128], index: 8, kind: input, shape index: {}]   ;;  %s2455_s9 = inlined_call_operand.vmem [shape: f32[1,128], index: 9, kind: input, shape index: {}]   ;;  %s2456_s10 = inlined_call_operand.vmem [shape: bf16[128,64], index: 10, kind: input, shape index: {}]   ;;  %s2457_s11 = inlined_call_operand.vmem [shape: f32[1,64], index: 11, kind: input, shape index: {}]   ;;  %s2458_s12 = inlined_call_operand.vmem [shape: bf16[64,128], index: 12, kind: input, shape index: {}]   ;;  %s2459_s13 = inlined_call_operand.vmem [shape: f32[1,128], index: 13, kind: input, shape index: {}]   ;;  %s2460_s14 = inlined_call_operand.hbm [shape: f32[4,128], index: 14, kind: output, shape index: {0}]   ;;  %s2461_s15 = inlined_call_operand.hbm [shape: f32[4,128], index: 15, kind: output, shape index: {1}]  }
   0x1   :  { %v1639_v0 = vld [vmem:[%s2447_s1] sm:$0xff]   ;;  %1590 = vmatprep.subr.bf16.mxu0 %v1886_v1  ;;  %1592 = vmatprep.mubr.msk.bf16.mxu0 %vm1887_vm0, %v1886_v1 }
   0x2   :  { %v52_v2 = vld [vmem:[%s2446_s0] sm:$0xf]  ;;  %1591 = vmatpush3.bf16.msra.mxu0 %v1639_v0  ;;  %v1642_v5 = vld [vmem:[%s2450_s4 + $0x4] ss:$16 sps:$4 sm:$0xff]  }
   0x3   :  { %v53_v3 = vpack.c.bf16 %v52_v2, %v52_v2  ;;  %v1640_v4 = vld [vmem:[%s2450_s4] ss:$16 sps:$4 sm:$0xff]   ;;  %v1645_v6 = vld [vmem:[%s2450_s4 + $0x24] ss:$16 sps:$4 sm:$0xff]   ;;  %312 = vmatprep.subr.bf16.mxu0 %v1642_v5 }
   0x4   :  { %v1643_v7 = vld [vmem:[%s2450_s4 + $0x20] ss:$16 sps:$4 sm:$0xff]   ;;  %v1648_v8 = vld [vmem:[%s2450_s4 + $0x44] ss:$16 sps:$4 sm:$0xff]  }
   0x5   :  { %1593 = vmatmul.mubr.msk.bf16.vlgmr.msra.gmra.mrb[0].mxu0 %vm69_vm1, %v53_v3  ;;  %v1646_v9 = vld [vmem:[%s2450_s4 + $0x40] ss:$16 sps:$4 sm:$0xff]   ;;  %v1651_v10 = vld [vmem:[%s2450_s4 + $0x64] ss:$16 sps:$4 sm:$0xff]  }
   0x6   :  { %313 = vmatpush1.bf16.msra.mxu0 %v1640_v4  ;;  %v1649_v11 = vld [vmem:[%s2450_s4 + $0x60] ss:$16 sps:$4 sm:$0xff]   ;;  %v1654_v12 = vld [vmem:[%s2450_s4 + $0x84] ss:$16 sps:$4 sm:$0xff]  }
   0x7   :  { %314 = vmatprep.subr.bf16.mxu0 %v1645_v6  ;;  %v1652_v13 = vld [vmem:[%s2450_s4 + $0x80] ss:$16 sps:$4 sm:$0xff]  }
   0xa   :  { %315 = vmatpush1.bf16.msra.mxu0 %v1643_v7 }
   0xb   :  { %316 = vmatprep.subr.bf16.mxu0 %v1648_v8 }
   0xe   :  { %317 = vmatpush1.bf16.msra.mxu0 %v1646_v9 }
   0xf   :  { %318 = vmatprep.subr.bf16.mxu0 %v1651_v10 }
  0x12   :  { %319 = vmatpush1.bf16.msra.mxu0 %v1649_v11 }
  0x13   :  { %320 = vmatprep.subr.bf16.mxu0 %v1654_v12 }
  0x16   :  { %321 = vmatpush1.bf16.msra.mxu0 %v1652_v13 }
  0x17   :  { %22 = vsyncpa [#allocation5], 0  ;;  %v1657_v14 = vld [vmem:[%s2450_s4 + $0xa4] ss:$16 sps:$4 sm:$0xff]   ;;  %v1655_v15 = vld [vmem:[%s2450_s4 + $0xa0] ss:$16 sps:$4 sm:$0xff]  }
  0x18   :  { %322 = vmatprep.subr.bf16.mxu0 %v1657_v14  ;;  %v1660_v16 = vld [vmem:[%s2450_s4 + $0xc4] ss:$16 sps:$4 sm:$0xff]   ;;  %v1658_v17 = vld [vmem:[%s2450_s4 + $0xc0] ss:$16 sps:$4 sm:$0xff]   ;;  %v1888_v22 = vmov 0   ;;  %vm1341_vm2 = vcmask 523264  }
  0x19   :  { %v1661_v18 = vld [vmem:[%s2449_s3 + $0x4] ss:$16 sps:$4 sm:$0xff]   ;;  %v1663_v19 = vld [vmem:[%s2449_s3] ss:$16 sps:$4 sm:$0xff]   ;;  %446 = vmatprep.mubr.bf16.mxu1 %v1888_v22  ;;  %344 = vmatprep.mubr.bf16.mxu0 %v1888_v22  ;;  %v1669_v23 = vld [vmem:[%s2450_s4 + $0xc] ss:$16 sps:$4 sm:$0xff]  }
  0x1a   :  { %323 = vmatpush1.bf16.msra.mxu0 %v1655_v15  ;;  %414 = vmatprep.subr.bf16.mxu1 %v1661_v18  ;;  %v1666_v20 = vld [vmem:[%s2450_s4 + $0xe4] ss:$16 sps:$4 sm:$0xff]   ;;  %v1664_v21 = vld [vmem:[%s2450_s4 + $0xe0] ss:$16 sps:$4 sm:$0xff]   ;;  %v1691_v24 = vld [vmem:[%s2449_s3 + $0x8] ss:$16 sps:$4 sm:$0xff]  }
  0x1b   :  { %324 = vmatprep.subr.bf16.mxu0 %v1660_v16  ;;  %415 = vmatpush1.bf16.msra.mxu1 %v1663_v19  ;;  %v1693_v25 = vld [vmem:[%s2449_s3 + $0xc] ss:$16 sps:$4 sm:$0xff]   ;;  %v1694_v26 = vld [vmem:[%s2452_s6] ss:$8 sps:$4 sm:$0xff]   ;;  %v1697_v29 = vld [vmem:[%s2452_s6 + $0x10] ss:$8 sps:$4 sm:$0xff]  }
  0x1c   :  { %455 = vmatprep.subr.bf16.mxu1 %v1693_v25  ;;  %v1696_v27 = vld [vmem:[%s2452_s6 + $0x4] ss:$8 sps:$4 sm:$0xff]   ;;  %v1699_v28 = vld [vmem:[%s2452_s6 + $0x14] ss:$8 sps:$4 sm:$0xff]   ;;  %v1700_v31 = vld [vmem:[%s2452_s6 + $0x20] ss:$8 sps:$4 sm:$0xff]  }
  0x1d   :  { %v1702_v30 = vld [vmem:[%s2452_s6 + $0x24] ss:$8 sps:$4 sm:$0xff]   ;;  %v1705_v32 = vld [vmem:[%s2452_s6 + $0x34] ss:$8 sps:$4 sm:$0xff]   ;;  %v1703_v33 = vld [vmem:[%s2452_s6 + $0x30] ss:$8 sps:$4 sm:$0xff]  }
  0x1e   :  { %325 = vmatpush1.bf16.msra.mxu0 %v1658_v17  ;;  %1454 = vmatmul.mubr.msk.bf16.vlgmr.msra.gmra.mrb[0].mxu1 %vm69_vm1, %v53_v3  ;;  %v1708_v34 = vld [vmem:[%s2452_s6 + $0x44] ss:$8 sps:$4 sm:$0xff]   ;;  %v1706_v35 = vld [vmem:[%s2452_s6 + $0x40] ss:$8 sps:$4 sm:$0xff]   ;;  %v1711_v36 = vld [vmem:[%s2452_s6 + $0x54] ss:$8 sps:$4 sm:$0xff]  }
  0x1f   :  { %326 = vmatprep.subr.bf16.mxu0 %v1666_v20  ;;  %487 = vmatprep.mubr.bf16.mxu1 %v1888_v22  ;;  %v1709_v37 = vld [vmem:[%s2452_s6 + $0x50] ss:$8 sps:$4 sm:$0xff]   ;;  %v1714_v38 = vld [vmem:[%s2452_s6 + $0x64] ss:$8 sps:$4 sm:$0xff]   ;;  %v1712_v39 = vld [vmem:[%s2452_s6 + $0x60] ss:$8 sps:$4 sm:$0xff]  }
  0x20   :  { %456 = vmatpush1.bf16.msra.mxu1 %v1691_v24  ;;  %v1717_v40 = vld [vmem:[%s2452_s6 + $0x74] ss:$8 sps:$4 sm:$0xff]   ;;  %v1715_v41 = vld [vmem:[%s2452_s6 + $0x70] ss:$8 sps:$4 sm:$0xff]   ;;  %v1720_v42 = vld [vmem:[%s2452_s6 + $0x84] ss:$8 sps:$4 sm:$0xff]  }
  0x21   :  { %926 = vmatprep.subr.bf16.mxu1 %v1696_v27  ;;  %v1718_v43 = vld [vmem:[%s2452_s6 + $0x80] ss:$8 sps:$4 sm:$0xff]   ;;  %v1723_v44 = vld [vmem:[%s2452_s6 + $0x94] ss:$8 sps:$4 sm:$0xff]   ;;  %v1721_v45 = vld [vmem:[%s2452_s6 + $0x90] ss:$8 sps:$4 sm:$0xff]  }
  0x22   :  { %327 = vmatpush1.bf16.msra.mxu0 %v1664_v21  ;;  %v1726_v46 = vld [vmem:[%s2452_s6 + $0xa4] ss:$8 sps:$4 sm:$0xff]   ;;  %v1724_v47 = vld [vmem:[%s2452_s6 + $0xa0] ss:$8 sps:$4 sm:$0xff]   ;;  %v1727_v48 = vld [vmem:[%s2452_s6 + $0xb0] ss:$8 sps:$4 sm:$0xff]  }
  0x23   :  { %353 = vmatprep.subr.bf16.mxu0 %v1669_v23  ;;  %v1729_v49 = vld [vmem:[%s2452_s6 + $0xb4] ss:$8 sps:$4 sm:$0xff]   ;;  %v1415_v50 = vld [vmem:[%s2448_s2] ss:$0 sm:$0xff]  ;;  %v1667_v57 = vld [vmem:[%s2450_s4 + $0x8] ss:$16 sps:$4 sm:$0xff]   ;;  %v498_v23 = vlaneseq }
  0x24   :  { %v1672_v59 = vld [vmem:[%s2450_s4 + $0x2c] ss:$16 sps:$4 sm:$0xff]   ;;  %v1670_v60 = vld [vmem:[%s2450_s4 + $0x28] ss:$16 sps:$4 sm:$0xff]  }
  0x25   :  { %v1675_v61 = vld [vmem:[%s2450_s4 + $0x4c] ss:$16 sps:$4 sm:$0xff]   ;;  %v1673_v62 = vld [vmem:[%s2450_s4 + $0x48] ss:$16 sps:$4 sm:$0xff]   ;;  %v2197_v24 = vshrl.u32 %v498_v23, 7 }
  0x26   :  { %1455 = vmatmul.mubr.msk.bf16.vlgmr.msra.gmra.mrb[4].mxu1 %vm69_vm1, %v53_v3  ;;  %v1678_v63 = vld [vmem:[%s2450_s4 + $0x6c] ss:$16 sps:$4 sm:$0xff]   ;;  %v1676_v0 = vld [vmem:[%s2450_s4 + $0x68] ss:$16 sps:$4 sm:$0xff]  }
  0x27   :  { %927 = vmatpush1.bf16.msra.mxu1 %v1694_v26  ;;  %v1681_v2 = vld [vmem:[%s2450_s4 + $0x8c] ss:$16 sps:$4 sm:$0xff]   ;;  %v1679_v3 = vld [vmem:[%s2450_s4 + $0x88] ss:$16 sps:$4 sm:$0xff]   ;;  %v508_v25 = vsub.s32 2, %v2197_v24 }
  0x28   :  { %928 = vmatprep.subr.bf16.mxu1 %v1699_v28  ;;  %v1684_v4 = vld [vmem:[%s2450_s4 + $0xac] ss:$16 sps:$4 sm:$0xff]   ;;  %v1682_v5 = vld [vmem:[%s2450_s4 + $0xa8] ss:$16 sps:$4 sm:$0xff]   ;;  %v496_v26 = vld [vmem:[%s2451_s5] sm:$0xf] }
  0x29   :  { %v1687_v6 = vld [vmem:[%s2450_s4 + $0xcc] ss:$16 sps:$4 sm:$0xff]   ;;  %v1685_v7 = vld [vmem:[%s2450_s4 + $0xc8] ss:$16 sps:$4 sm:$0xff]   ;;  %v2203_v28 = vrot.slane %v496_v26, %v508_v25 }
  0x2a   :  { %v1690_v8 = vld [vmem:[%s2450_s4 + $0xec] ss:$16 sps:$4 sm:$0xff]   ;;  %v1688_v9 = vld [vmem:[%s2450_s4 + $0xe8] ss:$16 sps:$4 sm:$0xff]  }
  0x2b   :  { %929 = vmatpush1.bf16.msra.mxu1 %v1697_v29  ;;  %v1732_v14 = vld [vmem:[%s2452_s6 + $0xc4] ss:$8 sps:$4 sm:$0xff]   ;;  %v1730_v15 = vld [vmem:[%s2452_s6 + $0xc0] ss:$8 sps:$4 sm:$0xff]   ;;  %v1735_v16 = vld [vmem:[%s2452_s6 + $0xd4] ss:$8 sps:$4 sm:$0xff]  }
  0x2c   :  { %930 = vmatprep.subr.bf16.mxu1 %v1702_v30  ;;  %v1733_v17 = vld [vmem:[%s2452_s6 + $0xd0] ss:$8 sps:$4 sm:$0xff]   ;;  %v1738_v18 = vld [vmem:[%s2452_s6 + $0xe4] ss:$8 sps:$4 sm:$0xff]   ;;  %v1736_v19 = vld [vmem:[%s2452_s6 + $0xe0] ss:$8 sps:$4 sm:$0xff]  }
  0x2d   :  { %v1741_v20 = vld [vmem:[%s2452_s6 + $0xf4] ss:$8 sps:$4 sm:$0xff]   ;;  %v1739_v21 = vld [vmem:[%s2452_s6 + $0xf0] ss:$8 sps:$4 sm:$0xff]   ;;  %v1774_v25 = vld [vmem:[%s2452_s6 + $0x1a4] ss:$8 sps:$4 sm:$0xff]  }
  0x2e   :  { %v1769_v23 = vld [vmem:[%s2452_s6 + $0x190] ss:$8 sps:$4 sm:$0xff]  }
  0x2f   :  { %931 = vmatpush1.bf16.msra.mxu1 %v1700_v31 }
  0x30   :  { %932 = vmatprep.subr.bf16.mxu1 %v1705_v32  ;;  %v1790_v32 = vld [vmem:[%s2454_s8 + $0x40] sm:$0xff]  }
  0x33   :  { %933 = vmatpush1.bf16.msra.mxu1 %v1703_v33  ;;  %v1791_v33 = vld [vmem:[%s2454_s8] sm:$0xff]  }
  0x34   :  { %934 = vmatprep.subr.bf16.mxu1 %v1708_v34  ;;  %v1792_v34 = vld [vmem:[%s2454_s8 + $0x48] sm:$0xff]  }
  0x37   :  { %935 = vmatpush1.bf16.msra.mxu1 %v1706_v35  ;;  %v1793_v35 = vld [vmem:[%s2454_s8 + $0x8] sm:$0xff]  }
  0x38   :  { %936 = vmatprep.subr.bf16.mxu1 %v1711_v36  ;;  %v1794_v36 = vld [vmem:[%s2454_s8 + $0x50] sm:$0xff]  }
  0x3b   :  { %937 = vmatpush1.bf16.msra.mxu1 %v1709_v37  ;;  %v1795_v37 = vld [vmem:[%s2454_s8 + $0x10] sm:$0xff]  }
  0x3c   :  { %938 = vmatprep.subr.bf16.mxu1 %v1714_v38  ;;  %v1796_v38 = vld [vmem:[%s2454_s8 + $0x58] sm:$0xff]  }
  0x3f   :  { %939 = vmatpush1.bf16.msra.mxu1 %v1712_v39  ;;  %v1797_v39 = vld [vmem:[%s2454_s8 + $0x18] sm:$0xff]  }
  0x40   :  { %940 = vmatprep.subr.bf16.mxu1 %v1717_v40  ;;  %v500_v40 = vsub.s32 0, %v2197_v24 }
  0x43   :  { %941 = vmatpush1.bf16.msra.mxu1 %v1715_v41  ;;  %v504_v41 = vsub.s32 1, %v2197_v24 }
  0x44   :  { %942 = vmatprep.subr.bf16.mxu1 %v1720_v42  ;;  %v501_v42 = vrot.slane %v496_v26, %v500_v40 }
  0x47   :  { %943 = vmatpush1.bf16.msra.mxu1 %v1718_v43 }
  0x48   :  { %944 = vmatprep.subr.bf16.mxu1 %v1723_v44  ;;  %v505_v44 = vrot.slane %v496_v26, %v504_v41 }
  0x4b   :  { %945 = vmatpush1.bf16.msra.mxu1 %v1721_v45 }
  0x4c   :  { %946 = vmatprep.subr.bf16.mxu1 %v1726_v46 }
  0x4f   :  { %947 = vmatpush1.bf16.msra.mxu1 %v1724_v47 }
  0x50   :  { %948 = vmatprep.subr.bf16.mxu1 %v1729_v49 }
  0x53   :  { %949 = vmatpush1.bf16.msra.mxu1 %v1727_v48 }
  0x54   :  { %950 = vmatprep.subr.bf16.mxu1 %v1732_v14  ;;  %v1762_v14 = vld [vmem:[%s2452_s6 + $0x164] ss:$8 sps:$4 sm:$0xff]  }
  0x57   :  { %951 = vmatpush1.bf16.msra.mxu1 %v1730_v15  ;;  %v1760_v15 = vld [vmem:[%s2452_s6 + $0x160] ss:$8 sps:$4 sm:$0xff]  }
  0x58   :  { %952 = vmatprep.subr.bf16.mxu1 %v1735_v16  ;;  %v1765_v16 = vld [vmem:[%s2452_s6 + $0x174] ss:$8 sps:$4 sm:$0xff]  }
  0x5b   :  { %953 = vmatpush1.bf16.msra.mxu1 %v1733_v17  ;;  %v1763_v17 = vld [vmem:[%s2452_s6 + $0x170] ss:$8 sps:$4 sm:$0xff]  }
  0x5c   :  { %954 = vmatprep.subr.bf16.mxu1 %v1738_v18  ;;  %v1768_v18 = vld [vmem:[%s2452_s6 + $0x184] ss:$8 sps:$4 sm:$0xff]  }
  0x5f   :  { %955 = vmatpush1.bf16.msra.mxu1 %v1736_v19 }
  0x60   :  { %956 = vmatprep.subr.bf16.mxu1 %v1741_v20 }
  0x63   :  { %957 = vmatpush1.bf16.msra.mxu1 %v1739_v21  ;;  %v1766_v21 = vld [vmem:[%s2452_s6 + $0x180] ss:$8 sps:$4 sm:$0xff]  }
  0xd8   :  { %v107_v51 = vpop.f32.mrb[0].mxu0 }
  0xd9   :  { %v108_v52 = vadd.f32 %v1415_v50, %v107_v51  ;;  %v1594_v53 = vpop.f32.mrb[1].mxu0 }
  0xda   :  { %v110_v54 = vpop.f32.mrb[2].mxu0 }
  0xdb   :  { %1818 = vtanh.f32 %v108_v52  ;;  %v1595_v55 = vpop.f32.mrb[3].mxu0 }
  0xdc   :  { %v1742_v55 = vld [vmem:[%s2452_s6 + $0x100] ss:$8 sps:$4 sm:$0xff]  }
  0xe5   :  { %v1819_v56 = vpop.eup %1818 }
  0xe6   :  { %114 = vst [vmem:[#allocation4] sm:$0xf] %v1819_v56  ;;  %v119_v58 = vpack.c.bf16 %v1819_v56, %v1819_v56 }
  0xe8   :  { %345 = vmatmul.mubr.bf16.vlgmr.msra.gmra.mrb[4].mxu0 %v119_v58 }
  0xe9   :  { %354 = vmatpush1.bf16.msra.mxu0 %v1667_v57  ;;  %385 = vmatprep.mubr.bf16.mxu0 %v1888_v22  ;;  %v1744_v22 = vld [vmem:[%s2452_s6 + $0x104] ss:$8 sps:$4 sm:$0xff]   ;;  %v1747_v57 = vld [vmem:[%s2452_s6 + $0x114] ss:$8 sps:$4 sm:$0xff]  }
  0xea   :  { %355 = vmatprep.subr.bf16.mxu0 %v1672_v59  ;;  %967 = vmatprep.subr.bf16.mxu1 %v1744_v22  ;;  %v1750_v59 = vld [vmem:[%s2452_s6 + $0x124] ss:$8 sps:$4 sm:$0xff]   ;;  %v1771_v22 = vld [vmem:[%s2452_s6 + $0x194] ss:$8 sps:$4 sm:$0xff]  }
  0xed   :  { %356 = vmatpush1.bf16.msra.mxu0 %v1670_v60  ;;  %v1748_v60 = vld [vmem:[%s2452_s6 + $0x120] ss:$8 sps:$4 sm:$0xff]  }
  0xee   :  { %357 = vmatprep.subr.bf16.mxu0 %v1675_v61  ;;  %v1753_v61 = vld [vmem:[%s2452_s6 + $0x134] ss:$8 sps:$4 sm:$0xff]  }
  0xf1   :  { %358 = vmatpush1.bf16.msra.mxu0 %v1673_v62  ;;  %v448_v10 = vpop.f32.mrb[0].mxu1  ;;  %v512_v62 = vsub.s32 3, %v2197_v24  ;;  %v1807_v24 = vld [vmem:[%s2456_s10 + $0x8] sm:$0xff]  }
  0xf2   :  { %359 = vmatprep.subr.bf16.mxu0 %v1678_v63  ;;  %v450_v11 = vpop.f32.mrb[1].mxu1  ;;  %v1751_v63 = vld [vmem:[%s2452_s6 + $0x130] ss:$8 sps:$4 sm:$0xff]  }
  0xf3   :  { %v452_v12 = vpop.f32.mrb[2].mxu1 }
  0xf4   :  { %v453_v13 = vpop.f32.mrb[3].mxu1 }
  0xf5   :  { %360 = vmatpush1.bf16.msra.mxu0 %v1676_v0  ;;  %v1756_v0 = vld [vmem:[%s2452_s6 + $0x144] ss:$8 sps:$4 sm:$0xff]   ;;  %v1757_v13 = vld [vmem:[%s2452_s6 + $0x150] ss:$8 sps:$4 sm:$0xff]  }
  0xf6   :  { %361 = vmatprep.subr.bf16.mxu0 %v1681_v2 }
  0xf9   :  { %362 = vmatpush1.bf16.msra.mxu0 %v1679_v3  ;;  %v489_v27 = vpop.f32.mrb[4].mxu1  ;;  %v513_v3 = vrot.slane %v496_v26, %v512_v62  ;;  %v1772_v26 = vld [vmem:[%s2452_s6 + $0x1a0] ss:$8 sps:$4 sm:$0xff]  }
  0xfa   :  { %363 = vmatprep.subr.bf16.mxu0 %v1684_v4  ;;  %v491_v29 = vpop.f32.mrb[5].mxu1 }
  0xfb   :  { %v493_v30 = vpop.f32.mrb[6].mxu1 }
  0xfc   :  { %v494_v31 = vpop.f32.mrb[7].mxu1  ;;  %v1778_v30 = vld [vmem:[%s2452_s6 + $0x1c0] ss:$8 sps:$4 sm:$0xff]  }
  0xfd   :  { %364 = vmatpush1.bf16.msra.mxu0 %v1682_v5  ;;  %v1783_v31 = vld [vmem:[%s2452_s6 + $0x1d4] ss:$8 sps:$4 sm:$0xff]  }
  0xfe   :  { %365 = vmatprep.subr.bf16.mxu0 %v1687_v6  ;;  %v1754_v6 = vld [vmem:[%s2452_s6 + $0x140] ss:$8 sps:$4 sm:$0xff]  }
 0x101   :  { %366 = vmatpush1.bf16.msra.mxu0 %v1685_v7 }
 0x102   :  { %367 = vmatprep.subr.bf16.mxu0 %v1690_v8 }
 0x105   :  { %368 = vmatpush1.bf16.msra.mxu0 %v1688_v9  ;;  %v1759_v9 = vld [vmem:[%s2452_s6 + $0x154] ss:$8 sps:$4 sm:$0xff]  }
 0x106   :  { %1554 = vmatprep.subr.bf16.mxu0 %v1790_v32  ;;  %v1781_v32 = vld [vmem:[%s2452_s6 + $0x1d0] ss:$8 sps:$4 sm:$0xff]  }
 0x108   :  { %386 = vmatmul.mubr.bf16.vlgmr.msra.gmra.mrb[8].mxu0 %v119_v58  ;;  %v1745_v58 = vld [vmem:[%s2452_s6 + $0x110] ss:$8 sps:$4 sm:$0xff]  }
 0x109   :  { %1555 = vmatpush3.bf16.msra.mxu0 %v1791_v33  ;;  %v1786_v33 = vld [vmem:[%s2452_s6 + $0x1e4] ss:$8 sps:$4 sm:$0xff]  }
 0x10a   :  { %1556 = vmatprep.subr.bf16.mxu0 %v1792_v34  ;;  %v1784_v34 = vld [vmem:[%s2452_s6 + $0x1e0] ss:$8 sps:$4 sm:$0xff]  }
 0x10d   :  { %1557 = vmatpush3.bf16.msra.mxu0 %v1793_v35  ;;  %v1789_v35 = vld [vmem:[%s2452_s6 + $0x1f4] ss:$8 sps:$4 sm:$0xff]  }
 0x10e   :  { %1558 = vmatprep.subr.bf16.mxu0 %v1794_v36  ;;  %v1787_v36 = vld [vmem:[%s2452_s6 + $0x1f0] ss:$8 sps:$4 sm:$0xff]  }
 0x111   :  { %1559 = vmatpush3.bf16.msra.mxu0 %v1795_v37 }
 0x112   :  { %1560 = vmatprep.subr.bf16.mxu0 %v1796_v38 }
 0x115   :  { %1561 = vmatpush3.bf16.msra.mxu0 %v1797_v39  ;;  %v1798_v39 = vld [vmem:[%s2454_s8 + $0x60] sm:$0xff]  }
 0x116   :  { %1562 = vmatprep.subr.bf16.mxu0 %v1798_v39 }
 0x1bb   :  { %v346_v43 = vpop.f32.mrb[4].mxu0 }
 0x1bc   :  { %v449_v45 = vadd.f32 %v448_v10, %v346_v43  ;;  %v348_v46 = vpop.f32.mrb[5].mxu0  ;;  %v1800_v43 = vld [vmem:[%s2454_s8 + $0x68] sm:$0xff]  }
 0x1bd   :  { %v451_v47 = vadd.f32 %v450_v11, %v348_v46  ;;  %v350_v48 = vpop.f32.mrb[6].mxu0  ;;  %v1803_v46 = vld [vmem:[%s2454_s8 + $0x30] sm:$0xff]  }
 0x1be   :  { %v518_v49 = vadd.f32 %v501_v42, %v449_v45  ;;  %v351_v50 = vpop.f32.mrb[7].mxu0  ;;  %v1799_v42 = vld [vmem:[%s2454_s8 + $0x20] sm:$0xff]   ;;  %v1802_v45 = vld [vmem:[%s2454_s8 + $0x70] sm:$0xff]   ;;  %v1805_v48 = vld [vmem:[%s2454_s8 + $0x38] sm:$0xff]  }
 0x1bf   :  { %v519_v51 = vadd.f32 %v505_v44, %v451_v47  ;;  %1563 = vmatpush3.bf16.msra.mxu0 %v1799_v42  ;;  %v1801_v44 = vld [vmem:[%s2454_s8 + $0x28] sm:$0xff]   ;;  %v1804_v47 = vld [vmem:[%s2454_s8 + $0x78] sm:$0xff]  }
 0x1c0   :  { %1820 = vtanh.f32 %v518_v49  ;;  %1564 = vmatprep.subr.bf16.mxu0 %v1800_v43  ;;  %v594_v49 = vld [vmem:[%s2453_s7] sm:$0x3]  ;;  %s1889_s7 = smov [#allocation4]  }
 0x1c1   :  { %1822 = vtanh.f32 %v519_v51  ;;  %v599_v50 = vrot.slane %v594_v49, %v500_v40  ;;  %v603_v51 = vrot.slane %v594_v49, %v504_v41  ;;  %v1808_v40 = vld [vmem:[%s2456_s10 + $0x10] sm:$0xff]   ;;  %v1809_v41 = vld [vmem:[%s2456_s10 + $0x18] sm:$0xff]   ;;  %s1403_s0 = sshll.u32 %s1889_s7, 4  ;;  %s1404_s0 = int_to_ptr.vmem [resolvable:$true] %s1403_s0 }
 0x1c2   :  { %s1838_s27 = scalar_lea.vmem %s1404_s0, 64  ;;  %p1843_p1 = scmp.lt.s32.totalorder %s1404_s0, %s1404_s0 }
 0x1c3   :  { %1565 = vmatpush3.bf16.msra.mxu0 %v1801_v44  ;;  %p1839_p0 = scmp.ne.s32.totalorder %s1404_s0, %s1838_s27  ;;  %p1844_p2 = scmp.lt.s32.totalorder %s1838_s27, %s1838_s27 }
 0x1c4   :  { %1566 = vmatprep.subr.bf16.mxu0 %v1802_v45 }
 0x1c5   :  { %p1845_p3 = por %p1844_p2, %p1843_p1 }
 0x1c7   :  { %1567 = vmatpush3.bf16.msra.mxu0 %v1803_v46  ;;  %p1846_p4 = pnand %p1845_p3, %p1839_p0 }
 0x1c8   :  { %1568 = vmatprep.subr.bf16.mxu0 %v1804_v47 }
 0x1ca   :  { %v1821_v52 = vpop.eup %1820 }
 0x1cb   :  { %v1823_v53 = vpop.eup %1822  ;;  %v526_v56 = vpack.c.bf16 %v1821_v52, %v1821_v52  ;;  %1569 = vmatpush3.bf16.msra.mxu0 %v1805_v48 }
 0x1cc   :  { %v527_v54 = vpack.c.bf16 %v1823_v53, %v1823_v53  ;;  %1596 = vmatprep.subr.bf16.mxu0 %v1886_v1 }
 0x1ce   :  { %958 = vmatprep.mubr.bf16.mxu1 %v527_v54 }
 0x1cf   :  { %959 = vmatmul.mubr.bf16.vlgmr.msra.gmra.mrb[8].mxu1 %v526_v56 }
 0x1d0   :  { %968 = vmatpush1.bf16.msra.mxu1 %v1742_v55 }
 0x1d1   :  { %969 = vmatprep.subr.bf16.mxu1 %v1747_v57 }
 0x1d4   :  { %970 = vmatpush1.bf16.msra.mxu1 %v1745_v58 }
 0x1d5   :  { %971 = vmatprep.subr.bf16.mxu1 %v1750_v59 }
 0x1d8   :  { %972 = vmatpush1.bf16.msra.mxu1 %v1748_v60 }
 0x1d9   :  { %973 = vmatprep.subr.bf16.mxu1 %v1753_v61  ;;  %v1806_v61 = vld [vmem:[%s2456_s10] sm:$0xff]  }
 0x1db   :  { %v387_v2 = vpop.f32.mrb[8].mxu0 }
 0x1dc   :  { %v490_v4 = vadd.f32 %v489_v27, %v387_v2  ;;  %v389_v5 = vpop.f32.mrb[9].mxu0  ;;  %974 = vmatpush1.bf16.msra.mxu1 %v1751_v63  ;;  %v1777_v27 = vld [vmem:[%s2452_s6 + $0x1b4] ss:$8 sps:$4 sm:$0xff]   ;;  %v1810_v63 = vld [vmem:[%s2456_s10 + $0x20] sm:$0xff]  }
 0x1dd   :  { %v492_v7 = vadd.f32 %v491_v29, %v389_v5  ;;  %v391_v8 = vpop.f32.mrb[10].mxu0  ;;  %975 = vmatprep.subr.bf16.mxu1 %v1756_v0  ;;  %v1780_v29 = vld [vmem:[%s2452_s6 + $0x1c4] ss:$8 sps:$4 sm:$0xff]   ;;  %v1812_v2 = vld [vmem:[%s2456_s10 + $0x30] sm:$0xff]   ;;  %v1520_v5 = vld [vmem:[%s2455_s9] ss:$0 sm:$0xff] }
 0x1de   :  { %v520_v10 = vadd.f32 %v2203_v28, %v490_v4  ;;  %v392_v11 = vpop.f32.mrb[11].mxu0  ;;  %v1775_v28 = vld [vmem:[%s2452_s6 + $0x1b0] ss:$8 sps:$4 sm:$0xff]   ;;  %v1811_v0 = vld [vmem:[%s2456_s10 + $0x28] sm:$0xff]  }
 0x1df   :  { %v521_v12 = vadd.f32 %v513_v3, %v492_v7  ;;  %v1813_v3 = vld [vmem:[%s2456_s10 + $0x38] sm:$0xff]  }
 0x1e0   :  { %976 = vmatpush1.bf16.msra.mxu1 %v1754_v6 }
 0x1e1   :  { %1824 = vtanh.f32 %v521_v12  ;;  %977 = vmatprep.subr.bf16.mxu1 %v1759_v9 }
 0x1e2   :  { %1826 = vtanh.f32 %v520_v10 }
 0x1e4   :  { %978 = vmatpush1.bf16.msra.mxu1 %v1757_v13  ;;  %v1814_v13 = vld [vmem:[%s2458_s12] sm:$0xff]  }
 0x1e5   :  { %979 = vmatprep.subr.bf16.mxu1 %v1762_v14  ;;  %v1815_v14 = vld [vmem:[%s2458_s12 + $0x8] sm:$0xff]  }
 0x1e8   :  { %980 = vmatpush1.bf16.msra.mxu1 %v1760_v15  ;;  %v1816_v15 = vld [vmem:[%s2458_s12 + $0x10] sm:$0xff]  }
 0x1e9   :  { %981 = vmatprep.subr.bf16.mxu1 %v1765_v16  ;;  %v1817_v16 = vld [vmem:[%s2458_s12 + $0x18] sm:$0xff]  }
 0x1eb   :  { %v1825_v19 = vpop.eup %1824 }
 0x1ec   :  { %982 = vmatpush1.bf16.msra.mxu1 %v1763_v17  ;;  %v529_v20 = vpack.c.bf16 %v1825_v19, %v1825_v19  ;;  %v1827_v37 = vpop.eup %1826  ;;  %v1537_v17 = vld [vmem:[%s2457_s11] ss:$0 sm:$0xff] }
 0x1ed   :  { %983 = vmatprep.subr.bf16.mxu1 %v1768_v18  ;;  %v528_v38 = vpack.c.bf16 %v1827_v37, %v1827_v37 }
 0x1ee   :  { %999 = vmatprep.mubr.bf16.mxu1 %v529_v20 }
 0x1f0   :  { %984 = vmatpush1.bf16.msra.mxu1 %v1766_v21 }
 0x1f1   :  { %985 = vmatprep.subr.bf16.mxu1 %v1771_v22 }
 0x1f4   :  { %986 = vmatpush1.bf16.msra.mxu1 %v1769_v23 }
 0x1f5   :  { %987 = vmatprep.subr.bf16.mxu1 %v1774_v25 }
 0x1f8   :  { %988 = vmatpush1.bf16.msra.mxu1 %v1772_v26 }
 0x1f9   :  { %989 = vmatprep.subr.bf16.mxu1 %v1777_v27 }
 0x1fc   :  { %990 = vmatpush1.bf16.msra.mxu1 %v1775_v28 }
 0x1fd   :  { %991 = vmatprep.subr.bf16.mxu1 %v1780_v29 }
 0x200   :  { %992 = vmatpush1.bf16.msra.mxu1 %v1778_v30 }
 0x201   :  { %993 = vmatprep.subr.bf16.mxu1 %v1783_v31 }
 0x204   :  { %994 = vmatpush1.bf16.msra.mxu1 %v1781_v32 }
 0x205   :  { %995 = vmatprep.subr.bf16.mxu1 %v1786_v33 }
 0x208   :  { %996 = vmatpush1.bf16.msra.mxu1 %v1784_v34 }
 0x209   :  { %997 = vmatprep.subr.bf16.mxu1 %v1789_v35 }
 0x20c   :  { %998 = vmatpush1.bf16.msra.mxu1 %v1787_v36 }
 0x20f   :  { %1000 = vmatmul.mubr.bf16.vlgmr.msra.gmra.mrb[8].mxu1 %v528_v38 }
 0x2e2   :  { %v1001_v52 = vpop.f32.mrb[8].mxu1 }
 0x2e3   :  { %v1628_v53 = vadd.f32 %v1001_v52, %v599_v50  ;;  %v1003_v54 = vpop.f32.mrb[9].mxu1 }
 0x2e4   :  { %v1629_v55 = vadd.f32 %v1003_v54, %v603_v51  ;;  %v1005_v56 = vpop.f32.mrb[10].mxu1 }
 0x2e5   :  { %1828 = vtanh.f32 %v1628_v53  ;;  %v1006_v57 = vpop.f32.mrb[11].mxu1 }
 0x2e6   :  { %1830 = vtanh.f32 %v1629_v55 }
 0x2ef   :  { %v1829_v58 = vpop.eup %1828 }
 0x2f0   :  { %v1831_v59 = vpop.eup %1830  ;;  %v1010_v62 = vpack.c.bf16 %v1829_v58, %v1829_v58 }
 0x2f1   :  { %v1011_v60 = vpack.c.bf16 %v1831_v59, %v1831_v59 }
 0x2f3   :  { %1179 = vmatprep.mubr.bf16.mxu0 %v1011_v60 }
 0x2f4   :  { %1180 = vmatmul.mubr.bf16.vlgmr.msra.gmra.mrb[12].mxu0 %v1010_v62 }
 0x2f5   :  { %1597 = vmatpush3.bf16.msra.mxu0 %v1806_v61  ;;  %1612 = vmatprep.mubr.msk.bf16.mxu0 %vm1887_vm0, %v1886_v1 }
 0x2f6   :  { %1598 = vmatprep.subr.bf16.mxu0 %v1886_v1 }
 0x2f9   :  { %1599 = vmatpush3.bf16.msra.mxu0 %v1807_v24 }
 0x2fa   :  { %1600 = vmatprep.subr.bf16.mxu0 %v1886_v1 }
 0x2fd   :  { %1601 = vmatpush3.bf16.msra.mxu0 %v1808_v40 }
 0x2fe   :  { %1602 = vmatprep.subr.bf16.mxu0 %v1886_v1 }
 0x301   :  { %1603 = vmatpush3.bf16.msra.mxu0 %v1809_v41 }
 0x302   :  { %1604 = vmatprep.subr.bf16.mxu0 %v1886_v1 }
 0x305   :  { %1605 = vmatpush3.bf16.msra.mxu0 %v1810_v63 }
 0x306   :  { %1606 = vmatprep.subr.bf16.mxu0 %v1886_v1 }
 0x309   :  { %1607 = vmatpush3.bf16.msra.mxu0 %v1811_v0 }
 0x30a   :  { %1608 = vmatprep.subr.bf16.mxu0 %v1886_v1 }
 0x30d   :  { %1609 = vmatpush3.bf16.msra.mxu0 %v1812_v2 }
 0x30e   :  { %1610 = vmatprep.subr.bf16.mxu0 %v1886_v1 }
 0x311   :  { %1611 = vmatpush3.bf16.msra.mxu0 %v1813_v3 }
 0x312   :  { %1616 = vmatprep.subr.bf16.mxu0 %v1886_v1 }
 0x3c7   :  { %v1570_v4 = vpop.f32.mrb[12].mxu0 }
 0x3c8   :  { %v1571_v6 = vpop.f32.mrb[13].mxu0 }
 0x3c9   :  { %v1572_v7 = vadd.f32 %v1571_v6, %v1570_v4  ;;  %v1573_v8 = vpop.f32.mrb[14].mxu0 }
 0x3ca   :  { %v1574_v9 = vpop.f32.mrb[15].mxu0 }
 0x3cb   :  { %v1182_v10 = vadd.f32 %v1572_v7, %v1520_v5 }
 0x3cd   :  { %1832 = vtanh.f32 %v1182_v10 }
 0x3d7   :  { %v1833_v11 = vpop.eup %1832 }
 0x3d8   :  { %v1188_v12 = vpack.c.bf16 %v1833_v11, %v1833_v11 }
 0x3da   :  { %1613 = vmatmul.mubr.bf16.vlgmr.msra.gmra.mrb[16].mxu0 %v1188_v12 }
 0x3db   :  { %1624 = vmatprep.mubr.msk.bf16.mxu0 %vm1887_vm0, %v1886_v1  ;;  %1617 = vmatpush3.bf16.msra.mxu0 %v1814_v13 }
 0x3dc   :  { %1618 = vmatprep.subr.bf16.mxu0 %v1886_v1 }
 0x3df   :  { %1619 = vmatpush3.bf16.msra.mxu0 %v1815_v14 }
 0x3e0   :  { %1620 = vmatprep.subr.bf16.mxu0 %v1886_v1 }
 0x3e3   :  { %1621 = vmatpush3.bf16.msra.mxu0 %v1816_v15 }
 0x3e4   :  { %1622 = vmatprep.subr.bf16.mxu0 %v1886_v1 }
 0x3e7   :  { %1623 = vmatpush3.bf16.msra.mxu0 %v1817_v16 }
 0x4ad   :  { %v1294_v18 = vpop.f32.mrb[16].mxu0 }
 0x4ae   :  { %v1295_v19 = vadd.f32 %v1537_v17, %v1294_v18  ;;  %v1614_v20 = vpop.f32.mrb[17].mxu0 }
 0x4af   :  { %v1297_v21 = vpop.f32.mrb[18].mxu0 }
 0x4b0   :  { %1834 = vtanh.f32 %v1295_v19  ;;  %v1615_v22 = vpop.f32.mrb[19].mxu0 }
 0x4ba   :  { %v1835_v23 = vpop.eup %1834 }
 0x4bb   :  { %v1301_v25 = vpack.c.bf16 %v1835_v23, %v1835_v23 }
 0x4bd   :  { %1625 = vmatmul.mubr.msk.bf16.vlgmr.msra.gmra.mrb[20].mxu0 %vm1341_vm2, %v1301_v25 }
 0x4be   :  { %1849 = shalt.err (!%p1846_p4)
}
 0x4bf   :  { %s1850_s2 = scalar_lea.hbm %s2461_s15, 64 }
 0x4c0   :  { %p1851_p5 = scmp.ne.s32.totalorder %s2461_s15, %s1850_s2  ;;  %p1854_p6 = scmp.lt.u32.totalorder %s1850_s2, %s2461_s15 }
 0x4c2   :  { %p1856_p7 = pnand %p1854_p6, %p1851_p5 }
 0x4c4   :  { %1859 = shalt.err (!%p1856_p7)
}
 0x4c5   :  { %1406 = dma.vmem_to_hbm [thread:$0]  %s1404_s0, 64, %s2461_s15, [#allocation5]   ;;  %v1546_v1 = vld [vmem:[%s2459_s13] ss:$0 sm:$0xff] }
 0x4c6   :  { %s1890_s3 = smov [#allocation2]  }
 0x4c7   :  { %s1393_s20 = sshll.u32 %s1890_s3, 4  ;;  %s1394_s20 = int_to_ptr.vmem [resolvable:$true] %s1393_s20 }
 0x4c8   :  { %s1860_s21 = scalar_lea.vmem %s1394_s20, 64  ;;  %p1865_p9 = scmp.lt.s32.totalorder %s1394_s20, %s1394_s20 }
 0x4c9   :  { %p1861_p8 = scmp.ne.s32.totalorder %s1394_s20, %s1860_s21  ;;  %p1866_p10 = scmp.lt.s32.totalorder %s1860_s21, %s1860_s21 }
 0x4cb   :  { %p1867_p11 = por %p1866_p10, %p1865_p9 }
 0x4cd   :  { %p1868_p12 = pnand %p1867_p11, %p1861_p8 }
 0x590   :  { %v1379_v26 = vpop.f32.mrb[20].mxu0 }
 0x591   :  { %v1380_v27 = vadd.f32 %v1546_v1, %v1379_v26  ;;  %v1626_v28 = vpop.f32.mrb[21].mxu0 }
 0x592   :  { %v1382_v29 = vpop.f32.mrb[22].mxu0 }
 0x593   :  { %1836 = vtanh.f32 %v1380_v27  ;;  %v1627_v30 = vpop.f32.mrb[23].mxu0 }
 0x59d   :  { %v1837_v31 = vpop.eup %1836 }
 0x59e   :  { %1386 = vst [vmem:[#allocation2] sm:$0xf] %v1837_v31 }
 0x59f   :  { %1871 = shalt.err (!%p1868_p12)
}
 0x5a0   :  { %s1872_s22 = scalar_lea.hbm %s2460_s14, 64 }
 0x5a1   :  { %p1873_p13 = scmp.ne.s32.totalorder %s2460_s14, %s1872_s22  ;;  %p1876_p0 = scmp.lt.u32.totalorder %s1872_s22, %s2460_s14 }
 0x5a3   :  { %p1878_p1 = pnand %p1876_p0, %p1873_p13 }
 0x5a5   :  { %1881 = shalt.err (!%p1878_p1)
}
 0x5a6   :  { %1396 = dma.vmem_to_hbm [thread:$0]  %s1394_s20, 64, %s2460_s14, [#allocation3]  }
 0x5a7   :  { %1882 = dma.done.wait [#allocation3], 64  }
 0x5a8   :  { %1883 = vsyncadd [#allocation3], 4294967232 }
 0x5a9   :  { %1884 = dma.done.wait [#allocation5], 64  }
 0x5aa   :  { %1885 = vsyncadd [#allocation5], 4294967232 }
 0x5ab   :  { %1413 = vsyncpa [#allocation3], 1 }
 0x5ac   :  { %1414 = vsyncpa [#allocation5], 1 }

</bundles_post_ra>
